<compile_context>
chip_gen: v6e
topology: v6e:2x2x1
jax: 0.10.0
libtpu: 0.0.40
codegen_flags: <defaults>
</compile_context>

<pallas_src>
import functools

import jax
import jax.numpy as jnp
from jax import lax
from jax.experimental import pallas as pl
from jax.experimental.pallas import tpu as pltpu

_LANE = 128
_CHUNK_ROWS = 512          # in-tile accumulation chunk (f32 intermediate <= 256 KiB)
_VMEM_LIMIT = 48 << 20     # safe on v5e/v6e (128 MiB phys) and v7x (64 MiB phys)


def _round_up(x, m):
    return (x + m - 1) // m * m


def _is_small_int_alpha(alpha):
    a = float(alpha)
    return a == int(a) and 0 <= int(a) <= 4


def _weights_from_base(base, alpha):
    """(|e| + 1) ** alpha, specialized so small integer alphas stay on the VPU."""
    a = float(alpha)
    if _is_small_int_alpha(a):
        ai = int(a)
        if ai == 0:
            return jnp.ones_like(base)
        bp1 = base + 1.0
        w = bp1
        for _ in range(ai - 1):
            w = w * bp1
        return w
    # general alpha: exp(alpha * log1p(|e|)) — two EUP transcendentals
    return jnp.exp(a * jnp.log1p(base))


def _hw_defaults():
    """(tile_rows, num_outer) defaults per TPU generation."""
    try:
        kind = jax.devices()[0].device_kind.lower()
    except Exception:  # pragma: no cover - defensive
        kind = ""
    if "v7" in kind:
        # 8192 rows = 4 MiB f32 / input / block; both TensorCores get rows.
        return 8192, 2
    # v5e / v6e (single TensorCore): 4096 rows = 2 MiB f32 / input / block.
    return 4096, 1


def _outlier_loss_kernel(pred_ref, true_ref, out_ref, *, alpha, rows_total,
                         tile_rows, chunk_rows, num_inner, needs_mask):
    """pred_ref/true_ref: (tile_rows, 128) tiles (input dtype).
    out_ref: (1, 8, 128) f32 lane-parallel partial-sum block (per outer index)."""
    o = pl.program_id(0)
    i = pl.program_id(1)

    @pl.when(i == 0)
    def _():
        out_ref[...] = jnp.zeros_like(out_ref)

    num_chunks = tile_rows // chunk_rows

    if needs_mask:
        # Row-level mask only: lane padding was already handled in the wrapper
        # (tail split), so only Pallas-padded rows of the partial tile and
        # clamped duplicate tiles need zeroing. Scalar threshold + one hoisted
        # iota; jnp.where discards any NaN/inf in the unselected branch.
        tile_idx = o * num_inner + i
        valid_rows = rows_total - tile_idx * tile_rows      # scalar (<=0 => all masked)
        row_iota = lax.broadcasted_iota(jnp.int32, (chunk_rows, _LANE), 0)

    acc = jnp.zeros((8, _LANE), jnp.float32)
    # Static chunk loop: keeps the f32 intermediate to (chunk_rows,128) and the
    # live range to a handful of vregs (accumulator + current chunk).
    for c in range(num_chunks):
        start = c * chunk_rows
        p = pred_ref[pl.ds(start, chunk_rows), :].astype(jnp.float32)
        t = true_ref[pl.ds(start, chunk_rows), :].astype(jnp.float32)
        base = jnp.abs(t - p)
        weighted = _weights_from_base(base, alpha) * base
        if needs_mask:
            weighted = jnp.where(row_iota < (valid_rows - start), weighted, 0.0)
        # Fold into the (8,128) vreg-shaped accumulator: pure VPU adds.
        acc = acc + weighted.reshape(chunk_rows // 8, 8, _LANE).sum(axis=0)

    out_ref[0] += acc


@functools.partial(jax.jit, static_argnames=("alpha", "tile_rows", "num_outer"))
def outlier_focused_loss(y_pred, y_true, alpha=2.0, *, tile_rows=None,
                         num_outer=None):
    """JAX/Pallas equivalent of OutlierFocusedLoss(alpha)(y_pred, y_true)."""
    assert y_pred.shape == y_true.shape
    n = y_pred.size

    default_tile, default_outer = _hw_defaults()
    if tile_rows is None:
        tile_rows = default_tile
    if num_outer is None:
        num_outer = default_outer

    flat_p = y_pred.reshape(-1)
    flat_t = y_true.reshape(-1)

    # Ragged path: reduce the <128-element tail in plain JAX (O(128) work),
    # keeping the kernel slab copy-free in the common numel % 128 == 0 case.
    tail = n % _LANE
    main_n = n - tail
    if tail:
        tp = flat_p[main_n:].astype(jnp.float32)
        tt = flat_t[main_n:].astype(jnp.float32)
        tb = jnp.abs(tt - tp)
        tail_sum = jnp.sum(_weights_from_base(tb, alpha) * tb)
    else:
        tail_sum = jnp.float32(0.0)

    rows = main_n // _LANE
    if rows == 0:
        return tail_sum / jnp.float32(n)

    if tail:
        p2 = flat_p[:main_n].reshape(rows, _LANE)
        t2 = flat_t[:main_n].reshape(rows, _LANE)
    else:
        p2 = flat_p.reshape(rows, _LANE)   # free layout change (no copy)
        t2 = flat_t.reshape(rows, _LANE)

    # Sublane multiple for the packed dtype (8 for 32-bit, 16 for 16-bit, ...).
    itemsize = jnp.dtype(p2.dtype).itemsize
    sub_mult = max(8, 32 // itemsize)
    tile_rows = max(sub_mult,
                    min(_round_up(tile_rows, sub_mult),
                        _round_up(rows, sub_mult)))
    chunk_rows = _CHUNK_ROWS if (tile_rows > _CHUNK_ROWS and
                                 tile_rows % _CHUNK_ROWS == 0) else tile_rows

    total_tiles = pl.cdiv(rows, tile_rows)
    num_outer = max(1, min(num_outer, total_tiles))
    num_inner = pl.cdiv(total_tiles, num_outer)
    needs_mask = (rows % tile_rows != 0) or (total_tiles % num_outer != 0)

    if needs_mask:
        def in_map(o, i):
            # Clamp so a trailing (masked-out) grid step never indexes past HBM.
            return (jnp.minimum(o * num_inner + i, total_tiles - 1), 0)
    else:
        def in_map(o, i):
            return (o * num_inner + i, 0)

    kernel = functools.partial(
        _outlier_loss_kernel, alpha=float(alpha), rows_total=rows,
        tile_rows=tile_rows, chunk_rows=chunk_rows, num_inner=num_inner,
        needs_mask=needs_mask)

    # Advisory cost: pure streaming op (2 HBM reads of n elements, tiny output).
    transcendentals = 0 if _is_small_int_alpha(alpha) else 2 * main_n
    cost = pl.CostEstimate(
        flops=8 * main_n,
        transcendentals=transcendentals,
        bytes_accessed=2 * main_n * itemsize + num_outer * 8 * _LANE * 4)

    partials = pl.pallas_call(
        kernel,
        out_shape=jax.ShapeDtypeStruct((num_outer, 8, _LANE), jnp.float32),
        grid_spec=pltpu.PrefetchScalarGridSpec(
            num_scalar_prefetch=0,
            grid=(num_outer, num_inner),
            in_specs=[
                pl.BlockSpec((tile_rows, _LANE), in_map),
                pl.BlockSpec((tile_rows, _LANE), in_map),
            ],
            # one lane-dense (8,128) partial-sum block per outer grid index
            out_specs=pl.BlockSpec((1, 8, _LANE), lambda o, i: (o, 0, 0)),
        ),
        compiler_params=pltpu.CompilerParams(
            # TODO(synk): if xprof shows one v7x core idle, switch axis 0 to
            # pltpu.CORE_PARALLEL / explicit core_map.
            dimension_semantics=("parallel", "arbitrary"),
            vmem_limit_bytes=_VMEM_LIMIT,
        ),
        cost_estimate=cost,
    )(p2, t2)

    # Tiny final reduce (num_outer * 1024 f32) + mean over the ORIGINAL count.
    return (jnp.sum(partials) + tail_sum) / jnp.float32(n)


def _reference(y_pred, y_true, alpha):
    err = y_true.astype(jnp.float32) - y_pred.astype(jnp.float32)
    base = jnp.abs(err)
    return jnp.mean(jnp.power(base + 1.0, alpha) * base)


if __name__ == "__main__":
    key = jax.random.PRNGKey(0)
    k1, k2, k3, k4 = jax.random.split(key, 4)

    # Primary example: regression output of shape (batch, C, H, W)
    alpha = 2.0
    shape = (2, 4, 16, 16)
    y_pred = jax.random.normal(k1, shape, dtype=jnp.float32)
    y_true = jax.random.normal(k2, shape, dtype=jnp.float32)
    loss = jax.block_until_ready(outlier_focused_loss(y_pred, y_true, alpha=alpha))
    ref = jax.block_until_ready(_reference(y_pred, y_true, alpha))
    assert jnp.allclose(loss, ref, rtol=2e-5, atol=1e-5), (loss, ref)

    # Exercise the multi-tile / parallel-outer / clamped+masked-tile path.
    yp2 = jax.random.normal(k3, (5, 8, 128), dtype=jnp.float32)
    yt2 = jax.random.normal(k4, (5, 8, 128), dtype=jnp.float32)
    loss2 = jax.block_until_ready(
        outlier_focused_loss(yp2, yt2, alpha=alpha, tile_rows=8, num_outer=2))
    ref2 = jax.block_until_ready(_reference(yp2, yt2, alpha))
    assert jnp.allclose(loss2, ref2, rtol=2e-5, atol=1e-5), (loss2, ref2)

    # Exercise the ragged (numel % 128 != 0) tail path and the general-alpha path.
    alpha3 = 2.5
    yp3 = jax.random.normal(k1, (2, 3, 17, 19), dtype=jnp.float32)
    yt3 = jax.random.normal(k2, (2, 3, 17, 19), dtype=jnp.float32)
    loss3 = jax.block_until_ready(outlier_focused_loss(yp3, yt3, alpha=alpha3))
    ref3 = jax.block_until_ready(_reference(yp3, yt3, alpha3))
    assert jnp.allclose(loss3, ref3, rtol=2e-5, atol=1e-5), (loss3, ref3)

    # Exercise the chunked-accumulation path (rows > _CHUNK_ROWS per tile).
    yp4 = jax.random.normal(k3, (8, 1024, 128), dtype=jnp.float32)   # rows = 8192
    yt4 = jax.random.normal(k4, (8, 1024, 128), dtype=jnp.float32)
    loss4 = jax.block_until_ready(outlier_focused_loss(yp4, yt4, alpha=alpha))
    ref4 = jax.block_until_ready(_reference(yp4, yt4, alpha))
    assert jnp.allclose(loss4, ref4, rtol=2e-5, atol=1e-5), (loss4, ref4)

    print("KERNEL_OK")
</pallas_src>

<mosaic_0001>
module attributes {stable_mosaic.version = 11 : i64} {
  func.func @_outlier_loss_kernel(%arg0: i32, %arg1: i32, %arg2: memref<16x128xf32, #tpu.memory_space<vmem>>, %arg3: memref<16x128xf32, #tpu.memory_space<vmem>>, %arg4: memref<1x8x128xf32, #tpu.memory_space<vmem>>) attributes {dimension_semantics = [#tpu.dimension_semantics<parallel>, #tpu.dimension_semantics<arbitrary>], iteration_bounds = array<i64: 1, 1>, scalar_prefetch = 0 : i64, scratch_operands = 0 : i64, tpu.core_type = #tpu.core_type<tc>, window_params = [{transform_indices = @transform_0, window_bounds = array<i64: 16, 128>}, {transform_indices = @transform_1, window_bounds = array<i64: 16, 128>}, {transform_indices = @transform_2, window_bounds = array<i64: 1, 8, 128>}]} {
    %c0_i32 = arith.constant 0 : i32
    %0 = arith.cmpi eq, %arg1, %c0_i32 : i32
    %1 = arith.extui %0 : i1 to i32
    %c0_i32_0 = arith.constant 0 : i32
    %2 = arith.cmpi ne, %1, %c0_i32_0 : i32
    scf.if %2 {
      %cst_12 = arith.constant 0.000000e+00 : f32
      %21 = vector.broadcast %cst_12 : f32 to vector<1x8x128xf32>
      %c0_13 = arith.constant 0 : index
      %c0_14 = arith.constant 0 : index
      %c0_15 = arith.constant 0 : index
      %22 = vector.load %arg4[%c0_13, %c0_14, %c0_15] : memref<1x8x128xf32, #tpu.memory_space<vmem>>, vector<1x8x128xf32>
      tpu.vector_store %arg4[%c0_13, %c0_14, %c0_15], %21 {strides = array<i32>} : memref<1x8x128xf32, #tpu.memory_space<vmem>>, vector<1x8x128xf32>,
    } else {
    }
    %cst = arith.constant 0.000000e+00 : f32
    %3 = vector.broadcast %cst : f32 to vector<8x128xf32>
    %c0 = arith.constant 0 : index
    %c0_1 = arith.constant 0 : index
    %4 = vector.load %arg2[%c0, %c0_1] : memref<16x128xf32, #tpu.memory_space<vmem>>, vector<16x128xf32>
    %c0_2 = arith.constant 0 : index
    %c0_3 = arith.constant 0 : index
    %5 = vector.load %arg3[%c0_2, %c0_3] : memref<16x128xf32, #tpu.memory_space<vmem>>, vector<16x128xf32>
    %6 = arith.subf %5, %4 : vector<16x128xf32>
    %7 = math.absf %6 : vector<16x128xf32>
    %cst_4 = arith.constant 1.000000e+00 : f32
    %8 = vector.broadcast %cst_4 : f32 to vector<16x128xf32>
    %9 = arith.addf %7, %8 : vector<16x128xf32>
    %10 = arith.mulf %9, %9 : vector<16x128xf32>
    %11 = arith.mulf %10, %7 : vector<16x128xf32>
    %12 = vector.shape_cast %11 : vector<16x128xf32> to vector<2x8x128xf32>
    %cst_5 = arith.constant dense<0.000000e+00> : vector<8x128xf32>
    %13 = vector.multi_reduction <add>, %12, %cst_5 [0] : vector<2x8x128xf32> to vector<8x128xf32>
    %14 = arith.addf %3, %13 : vector<8x128xf32>
    %c0_6 = arith.constant 0 : index
    %c0_7 = arith.constant 0 : index
    %c0_8 = arith.constant 0 : index
    %15 = vector.load %arg4[%c0_6, %c0_7, %c0_8] : memref<1x8x128xf32, #tpu.memory_space<vmem>>, vector<1x8x128xf32>
    %16 = vector.shape_cast %15 : vector<1x8x128xf32> to vector<8x128xf32>
    %17 = arith.addf %16, %14 : vector<8x128xf32>
    %c0_9 = arith.constant 0 : index
    %c0_10 = arith.constant 0 : index
    %c0_11 = arith.constant 0 : index
    %18 = vector.load %arg4[%c0_9, %c0_10, %c0_11] : memref<1x8x128xf32, #tpu.memory_space<vmem>>, vector<1x8x128xf32>
    %19 = vector.shape_cast %18 : vector<1x8x128xf32> to vector<8x128xf32>
    %20 = vector.shape_cast %17 : vector<8x128xf32> to vector<1x8x128xf32>
    tpu.vector_store %arg4[%c0_9, %c0_10, %c0_11], %20 {strides = array<i32>} : memref<1x8x128xf32, #tpu.memory_space<vmem>>, vector<1x8x128xf32>,
    return
  }
  func.func @transform_0(%arg0: i32, %arg1: i32) -> (i32, i32) {
    %c1_i32 = arith.constant 1 : i32
    %0 = arith.muli %arg0, %c1_i32 : i32
    %1 = arith.addi %0, %arg1 : i32
    %c0_i32 = arith.constant 0 : i32
    %c0_i32_0 = arith.constant 0 : i32
    return %1, %c0_i32 : i32, i32
  }
  func.func @transform_1(%arg0: i32, %arg1: i32) -> (i32, i32) {
    %c1_i32 = arith.constant 1 : i32
    %0 = arith.muli %arg0, %c1_i32 : i32
    %1 = arith.addi %0, %arg1 : i32
    %c0_i32 = arith.constant 0 : i32
    %c0_i32_0 = arith.constant 0 : i32
    return %1, %c0_i32 : i32, i32
  }
  func.func @transform_2(%arg0: i32, %arg1: i32) -> (i32, i32, i32) {
    %c0_i32 = arith.constant 0 : i32
    %c0_i32_0 = arith.constant 0 : i32
    %c0_i32_1 = arith.constant 0 : i32
    return %arg0, %c0_i32, %c0_i32_0 : i32, i32, i32
  }
}

</mosaic_0001>

<bundles_post_ra>
// kernel: outlier_focused_loss.1
= control target key start
LH: loop header
LB: loop body
LE: loop exit
PB: predicated region body
PF: predicated region fallthrough
CT: control target
= control target key end

     0   :  { %s126_s0 = inlined_call_operand.vmem [shape: f32[16,128], index: 0, kind: input, shape index: {}]   ;;  %s127_s1 = inlined_call_operand.vmem [shape: f32[16,128], index: 1, kind: input, shape index: {}]   ;;  %s128_s2 = inlined_call_operand.vmem [shape: f32[1,8,128], index: 2, kind: output, shape index: {}]  }
   0x1   :  { %v60_v0 = vld [vmem:[%s126_s0] sm:$0xff]  ;;  %v61_v1 = vld [vmem:[%s126_s0 + $0x8] sm:$0xff] }
   0x2   :  { %v62_v2 = vld [vmem:[%s127_s1] sm:$0xff]  ;;  %v63_v3 = vld [vmem:[%s127_s1 + $0x8] sm:$0xff] }
   0x3   :  { %v64_v4 = vsub.f32 %v62_v2, %v60_v0  ;;  %v65_v5 = vsub.f32 %v63_v3, %v61_v1 }
   0x5   :  { %v66_v6 = vand.u32 2147483647, %v64_v4  ;;  %v67_v7 = vand.u32 2147483647, %v65_v5 }
   0x7   :  { %v68_v8 = vadd.f32 1.0, %v66_v6  ;;  %v69_v9 = vadd.f32 1.0, %v67_v7 }
   0x9   :  { %v70_v10 = vmul.f32 %v68_v8, %v68_v8  ;;  %v71_v11 = vmul.f32 %v69_v9, %v69_v9 }
   0xb   :  { %v72_v12 = vmul.f32 %v70_v10, %v66_v6  ;;  %v73_v13 = vmul.f32 %v71_v11, %v67_v7 }
   0xd   :  { %v74_v14 = vadd.f32 %v73_v13, %v72_v12 }
   0xf   :  { %78 = vst [vmem:[%s128_s2] sm:$0xff] %v74_v14 }

</bundles_post_ra>
